<compile_context>
chip_gen: v5e
topology: v5e:2x2
jax: 0.10.0
libtpu: 0.0.40
codegen_flags: <defaults>
</compile_context>

<pallas_src>
import functools

import jax
import jax.numpy as jnp
from jax.experimental import pallas as pl
from jax.experimental.pallas import tpu as pltpu

BN_EPS = 1e-5


# --------------------------- sizing helpers ---------------------------------

def _round_up(v, m):
    return ((v + m - 1) // m) * m


def _vmem_budget():
    """(vmem_limit_bytes, adj_tile_budget_bytes) sized per TPU generation."""
    cap = None
    try:
        info = pltpu.get_tpu_info()
        for name in ("vmem_capacity_bytes", "vmem_bytes", "vmem_size_bytes"):
            val = getattr(info, name, None)
            if val:
                cap = int(val)
                break
    except Exception:
        cap = None
    if cap is None:
        cap = 64 * 1024 * 1024                      # conservative: assume v7x-class
    if cap >= 96 * 1024 * 1024:                     # v5e / v6e (128 MiB physical VMEM)
        return 96 * 1024 * 1024, 8 * 1024 * 1024
    return 32 * 1024 * 1024, 2 * 1024 * 1024        # v7x-class (64 MiB physical VMEM)


def _pick_row_tile(n_nodes, requested=None, adj_tile_budget_bytes=2 << 20):
    """Row tile: multiple of 128 (prefer 256 for the MXU), sized so one (tm, N_pad)
    bf16 adjacency tile fits the per-generation budget (Pallas double-buffers it)."""
    if requested is not None:
        return max(128, _round_up(int(requested), 128))
    n_cols = _round_up(max(n_nodes, 1), 128)
    budget_rows = adj_tile_budget_bytes // (2 * n_cols)
    tm = (budget_rows // 128) * 128
    if tm >= 256:
        tm = (tm // 256) * 256
    tm = min(max(tm, 128), 1024, _round_up(n_nodes, 128))
    return max(tm, 128)


# --------------------------- Pallas kernels ---------------------------------

def _row_valid(tile_rows, n_real):
    row0 = pl.program_id(0) * tile_rows
    return ((jax.lax.broadcasted_iota(jnp.int32, (tile_rows, 1), 0) + row0)
            < n_real).astype(jnp.float32)


def gin_agg_mlp1_kernel(adj_ref, h_ref, w1_ref, b1_ref, z1_ref, s1_ref, q1_ref,
                        *, n_real):
    """Row tile: pooled = adj_tile @ h ; z1 = pooled @ W1 + b1 ; masked BN partials."""
    pooled = jnp.dot(adj_ref[...], h_ref[...], preferred_element_type=jnp.float32)
    z1 = jnp.dot(pooled.astype(jnp.bfloat16), w1_ref[...],
                 preferred_element_type=jnp.float32) + b1_ref[...]
    z1_ref[...] = z1.astype(z1_ref.dtype)
    valid = _row_valid(adj_ref.shape[0], n_real)          # exclude padded rows
    zv = z1 * valid
    s1_ref[0] = jnp.sum(zv, axis=0, keepdims=True)
    q1_ref[0] = jnp.sum(zv * z1, axis=0, keepdims=True)


def gin_bn1_mlp2_kernel(z1_ref, a1_ref, b1_ref, w2_ref, b2_ref,
                        z2_ref, s2_ref, q2_ref, *, n_real):
    """Row tile: t = relu(z1*a1 + b1) ; z2 = t @ W2 + b2 ; masked BN partials."""
    t = jnp.maximum(z1_ref[...].astype(jnp.float32) * a1_ref[...] + b1_ref[...], 0.0)
    z2 = jnp.dot(t.astype(jnp.bfloat16), w2_ref[...],
                 preferred_element_type=jnp.float32) + b2_ref[...]
    z2_ref[...] = z2.astype(z2_ref.dtype)
    valid = _row_valid(z1_ref.shape[0], n_real)
    zv = z2 * valid
    s2_ref[0] = jnp.sum(zv, axis=0, keepdims=True)
    q2_ref[0] = jnp.sum(zv * z2, axis=0, keepdims=True)


def gin_bn_relu_kernel(z_ref, a_ref, b_ref, h_ref):
    """Row tile: next-layer node features h = relu(z*a + b), stored bf16."""
    h = jnp.maximum(z_ref[...].astype(jnp.float32) * a_ref[...] + b_ref[...], 0.0)
    h_ref[...] = h.astype(h_ref.dtype)


def heads_kernel(z2_ref, a2_ref, b2_ref, pool_ref, onehot_ref, scale_ref,
                 mask_ref, rep_ref,
                 wc1_ref, bc1_ref, wc2_ref, bc2_ref,
                 wa1t_ref, wa1b_ref, ba1_ref, wa2_ref, ba2_ref,
                 pi_ref, v_ref, hp_acc, cand_acc):
    """Tiled over node rows: final BN+ReLU, graph pooling + candidate gather are
    accumulated into VMEM scratch; critic/actor MLPs + per-graph masked softmax
    run on the last tile."""
    i = pl.program_id(0)

    @pl.when(i == 0)
    def _():
        hp_acc[...] = jnp.zeros_like(hp_acc)
        cand_acc[...] = jnp.zeros_like(cand_acc)

    h = jnp.maximum(z2_ref[...].astype(jnp.float32) * a2_ref[...] + b2_ref[...], 0.0)
    h_bf = h.astype(jnp.bfloat16)
    hp_acc[...] += jnp.dot(pool_ref[...], h_bf, preferred_element_type=jnp.float32)
    cand_acc[...] += jnp.dot(onehot_ref[...], h_bf, preferred_element_type=jnp.float32)

    @pl.when(i == pl.num_programs(0) - 1)
    def _():
        hp = hp_acc[...] * scale_ref[...]                 # average-pool rescale in f32
        hp_bf = hp.astype(jnp.bfloat16)

        # critic head
        tc = jnp.tanh(jnp.dot(hp_bf, wc1_ref[...],
                              preferred_element_type=jnp.float32) + bc1_ref[...])
        v_ref[...] = jnp.dot(tc, wc2_ref[...],
                             preferred_element_type=jnp.float32) + bc2_ref[...]

        # actor head (split weight: top @ candidate_feature + bottom @ h_pooled)
        cand_bf = cand_acc[...].astype(jnp.bfloat16)
        hp_bot = jnp.dot(hp_bf, wa1b_ref[...], preferred_element_type=jnp.float32)
        rep = rep_ref[...]                                               # (BJ, B) 0/1
        hp_rep = jnp.dot(rep.astype(jnp.bfloat16), hp_bot.astype(jnp.bfloat16),
                         preferred_element_type=jnp.float32)             # (BJ, Ha)
        hidden = jnp.tanh(jnp.dot(cand_bf, wa1t_ref[...],
                                  preferred_element_type=jnp.float32)
                          + hp_rep + ba1_ref[...])
        scores = jnp.dot(hidden, wa2_ref[...],
                         preferred_element_type=jnp.float32) + ba2_ref[...]   # (BJ, 1)

        # per-graph masked softmax (exact division, per-graph max shift)
        masked = jnp.where(mask_ref[...] > 0.5, -jnp.inf, scores)        # (BJ, 1)
        member = rep > 0.5                                               # (BJ, B)
        vals = jnp.where(member, masked, -jnp.inf)
        gmax = jnp.max(vals, axis=0, keepdims=True)                      # (1, B)
        gmax = jnp.where(gmax > -jnp.inf, gmax, 0.0)                     # all-masked guard
        gmax_rows = jnp.sum(rep * gmax, axis=1, keepdims=True)           # (BJ, 1)
        e = jnp.exp(masked - gmax_rows)
        seg = jnp.sum(rep * e, axis=0, keepdims=True)                    # (1, B)
        denom = jnp.sum(rep * seg, axis=1, keepdims=True)                # (BJ, 1)
        pi_ref[...] = e / jnp.maximum(denom, 1e-30)


# ------------------------------ wrapper --------------------------------------

def _bn_scale_shift(s, q, gamma, beta, n_real):
    """Reduce per-tile BN partials once (wrapper side): a = g*inv_std, b = be - g*mean*inv_std."""
    mean = jnp.sum(s, axis=(0, 1)) / n_real
    msq = jnp.sum(q, axis=(0, 1)) / n_real
    var = jnp.maximum(msq - mean * mean, 0.0)
    inv = jax.lax.rsqrt(var + BN_EPS)
    g = gamma.reshape(-1)
    be = beta.reshape(-1)
    a = (g * inv)[None, :].astype(jnp.float32)
    b = (be - g * mean * inv)[None, :].astype(jnp.float32)
    return a, b


def actor_critic_forward(params, x, n_j, graph_pool, padded_nei, adj, candidate, mask,
                         *, row_tile=None):
    del padded_nei  # unused for neighbor_pooling_type="sum", learn_eps=False
    N = x.shape[0]
    B = graph_pool.shape[0]
    n_per = N // B                       # equal-size graphs (as in L2D)
    n_j = candidate.shape[1]
    BJ = B * n_j

    vmem_limit, adj_budget = _vmem_budget()
    tm = _pick_row_tile(N, row_tile, adj_budget)
    nt = -(-N // tm)
    if nt > 1 and nt % 2 == 1:
        nt += 1                          # balanced halves for the two v7x TensorCores
    N_pad = nt * tm
    pad_n = N_pad - N

    gin_cparams = pltpu.CompilerParams(dimension_semantics=("parallel",),
                                       vmem_limit_bytes=vmem_limit)

    adj_bf = jnp.pad(adj, ((0, pad_n), (0, pad_n))).astype(jnp.bfloat16)  # 0/1: exact

    # zero-pad raw feature dim to lane-dense 128 (matching zero rows in W1 -> identical z1)
    feat_in = x.shape[1]
    feat_pad = max(128, _round_up(feat_in, 128))
    h = jnp.pad(x, ((0, pad_n), (0, feat_pad - feat_in))).astype(jnp.bfloat16)

    n_gin = len(params["gin"])
    z2 = a2 = b2s = None
    for li, lp in enumerate(params["gin"]):
        hin = h.shape[1]
        w1 = lp["w1"]
        if w1.shape[0] < hin:
            w1 = jnp.pad(w1, ((0, hin - w1.shape[0]), (0, 0)))
        h1 = w1.shape[1]
        h2 = lp["w2"].shape[1]

        # pass 1: neighbor aggregation + first GIN-MLP linear + masked BN1 partials
        z1, s1, q1 = pl.pallas_call(
            functools.partial(gin_agg_mlp1_kernel, n_real=N),
            grid=(nt,),
            in_specs=[
                pl.BlockSpec((tm, N_pad), lambda i: (i, 0)),     # adj row tile (bf16)
                pl.BlockSpec((N_pad, hin), lambda i: (0, 0)),    # h, resident
                pl.BlockSpec((hin, h1), lambda i: (0, 0)),       # W1, resident
                pl.BlockSpec((1, h1), lambda i: (0, 0)),         # b1
            ],
            out_specs=(
                pl.BlockSpec((tm, h1), lambda i: (i, 0)),
                pl.BlockSpec((1, 1, h1), lambda i: (i, 0, 0)),
                pl.BlockSpec((1, 1, h1), lambda i: (i, 0, 0)),
            ),
            out_shape=(
                jax.ShapeDtypeStruct((N_pad, h1), jnp.bfloat16),
                jax.ShapeDtypeStruct((nt, 1, h1), jnp.float32),
                jax.ShapeDtypeStruct((nt, 1, h1), jnp.float32),
            ),
            compiler_params=gin_cparams,
        )(adj_bf, h, w1.astype(jnp.bfloat16), lp["b1"])

        a1, b1s = _bn_scale_shift(s1, q1, lp["g1"], lp["be1"], N)

        # pass 2: BN1(FMA) + ReLU + second GIN-MLP linear + masked BN2 partials
        z2, s2, q2 = pl.pallas_call(
            functools.partial(gin_bn1_mlp2_kernel, n_real=N),
            grid=(nt,),
            in_specs=[
                pl.BlockSpec((tm, h1), lambda i: (i, 0)),
                pl.BlockSpec((1, h1), lambda i: (0, 0)),
                pl.BlockSpec((1, h1), lambda i: (0, 0)),
                pl.BlockSpec((h1, h2), lambda i: (0, 0)),
                pl.BlockSpec((1, h2), lambda i: (0, 0)),
            ],
            out_specs=(
                pl.BlockSpec((tm, h2), lambda i: (i, 0)),
                pl.BlockSpec((1, 1, h2), lambda i: (i, 0, 0)),
                pl.BlockSpec((1, 1, h2), lambda i: (i, 0, 0)),
            ),
            out_shape=(
                jax.ShapeDtypeStruct((N_pad, h2), jnp.bfloat16),
                jax.ShapeDtypeStruct((nt, 1, h2), jnp.float32),
                jax.ShapeDtypeStruct((nt, 1, h2), jnp.float32),
            ),
            compiler_params=gin_cparams,
        )(z1, a1, b1s, lp["w2"].astype(jnp.bfloat16), lp["b2"])

        a2, b2s = _bn_scale_shift(s2, q2, lp["g2"], lp["be2"], N)

        if li < n_gin - 1:
            # pass 3: BN2(FMA) + ReLU -> next layer's bf16 node features
            h = pl.pallas_call(
                gin_bn_relu_kernel,
                grid=(nt,),
                in_specs=[
                    pl.BlockSpec((tm, h2), lambda i: (i, 0)),
                    pl.BlockSpec((1, h2), lambda i: (0, 0)),
                    pl.BlockSpec((1, h2), lambda i: (0, 0)),
                ],
                out_specs=pl.BlockSpec((tm, h2), lambda i: (i, 0)),
                out_shape=jax.ShapeDtypeStruct((N_pad, h2), jnp.bfloat16),
                compiler_params=gin_cparams,
            )(z2, a2, b2s)
    # last GIN layer's BN2 + ReLU is fused into the heads kernel below.

    # wrapper-side layout plumbing (tiny 0/1 matrices)
    H = params["gin"][-1]["w2"].shape[1]
    cand_glob = (candidate.astype(jnp.int32)
                 + (jnp.arange(B, dtype=jnp.int32) * n_per)[:, None]).reshape(BJ)
    onehot = (cand_glob[:, None]
              == jnp.arange(N_pad, dtype=jnp.int32)[None, :]).astype(jnp.bfloat16)
    pool01 = jnp.pad((graph_pool > 0).astype(jnp.bfloat16), ((0, 0), (0, pad_n)))
    cnt = jnp.maximum(jnp.sum((graph_pool > 0).astype(jnp.float32), axis=1,
                              keepdims=True), 1.0)
    pool_scale = jnp.sum(graph_pool.astype(jnp.float32), axis=1, keepdims=True) / cnt
    mask_col = mask.reshape(BJ, 1).astype(jnp.float32)
    rep = (jnp.arange(BJ, dtype=jnp.int32)[:, None] // n_j
           == jnp.arange(B, dtype=jnp.int32)[None, :]).astype(jnp.float32)

    ap, cp = params["actor"], params["critic"]
    Ha = ap["w1_top"].shape[1]
    Hc = cp["w1"].shape[1]

    pi_col, v = pl.pallas_call(
        heads_kernel,
        grid=(nt,),
        in_specs=[
            pl.BlockSpec((tm, H), lambda i: (i, 0)),       # z2 row tile (bf16)
            pl.BlockSpec((1, H), lambda i: (0, 0)),        # a2
            pl.BlockSpec((1, H), lambda i: (0, 0)),        # b2s
            pl.BlockSpec((B, tm), lambda i: (0, i)),       # pool01 column tile (bf16)
            pl.BlockSpec((BJ, tm), lambda i: (0, i)),      # onehot column tile (bf16)
            pl.BlockSpec((B, 1), lambda i: (0, 0)),        # pool scale (f32)
            pl.BlockSpec((BJ, 1), lambda i: (0, 0)),       # mask
            pl.BlockSpec((BJ, B), lambda i: (0, 0)),       # rep (0/1)
            pl.BlockSpec((H, Hc), lambda i: (0, 0)),       # critic W1 (bf16)
            pl.BlockSpec((1, Hc), lambda i: (0, 0)),
            pl.BlockSpec((Hc, 1), lambda i: (0, 0)),       # critic W2 (f32, width-1)
            pl.BlockSpec((1, 1), lambda i: (0, 0)),
            pl.BlockSpec((H, Ha), lambda i: (0, 0)),       # actor W1 top (bf16)
            pl.BlockSpec((H, Ha), lambda i: (0, 0)),       # actor W1 bottom (bf16)
            pl.BlockSpec((1, Ha), lambda i: (0, 0)),
            pl.BlockSpec((Ha, 1), lambda i: (0, 0)),       # actor W2 (f32, width-1)
            pl.BlockSpec((1, 1), lambda i: (0, 0)),
        ],
        out_specs=(pl.BlockSpec((BJ, 1), lambda i: (0, 0)),
                   pl.BlockSpec((B, 1), lambda i: (0, 0))),
        out_shape=(jax.ShapeDtypeStruct((BJ, 1), jnp.float32),
                   jax.ShapeDtypeStruct((B, 1), jnp.float32)),
        scratch_shapes=[pltpu.VMEM((B, H), jnp.float32),
                        pltpu.VMEM((BJ, H), jnp.float32)],
        compiler_params=pltpu.CompilerParams(dimension_semantics=("arbitrary",),
                                             vmem_limit_bytes=vmem_limit),
    )(z2, a2, b2s, pool01, onehot, pool_scale, mask_col, rep,
      cp["w1"].astype(jnp.bfloat16), cp["b1"], cp["w2"], cp["b2"],
      ap["w1_top"].astype(jnp.bfloat16), ap["w1_bot"].astype(jnp.bfloat16),
      ap["b1"], ap["w2"], ap["b2"])

    return pi_col.reshape(B, n_j, 1), v


# --------------------------- pure-JAX reference ------------------------------

def _bn_scale_shift_dense(z, gamma, beta):
    mean = jnp.mean(z, axis=0)
    msq = jnp.mean(z * z, axis=0)
    var = jnp.maximum(msq - mean * mean, 0.0)
    inv = jax.lax.rsqrt(var + BN_EPS)
    g = gamma.reshape(-1)
    be = beta.reshape(-1)
    return (g * inv)[None, :], (be - g * mean * inv)[None, :]


def reference_forward(params, x, graph_pool, adj, candidate, mask):
    """Mirrors the kernel's bf16 casting so it validates the Pallas plumbing."""
    N = x.shape[0]
    B = graph_pool.shape[0]
    n_j = candidate.shape[1]
    BJ = B * n_j
    n_per = N // B

    adj_bf = adj.astype(jnp.bfloat16)
    h = x.astype(jnp.bfloat16)
    hf = None
    for lp in params["gin"]:
        pooled = jnp.dot(adj_bf, h, preferred_element_type=jnp.float32)
        z1 = jnp.dot(pooled.astype(jnp.bfloat16), lp["w1"].astype(jnp.bfloat16),
                     preferred_element_type=jnp.float32) + lp["b1"]
        a1, b1s = _bn_scale_shift_dense(z1, lp["g1"], lp["be1"])
        z1b = z1.astype(jnp.bfloat16).astype(jnp.float32)
        t = jnp.maximum(z1b * a1 + b1s, 0.0)
        z2 = jnp.dot(t.astype(jnp.bfloat16), lp["w2"].astype(jnp.bfloat16),
                     preferred_element_type=jnp.float32) + lp["b2"]
        a2, b2s = _bn_scale_shift_dense(z2, lp["g2"], lp["be2"])
        z2b = z2.astype(jnp.bfloat16).astype(jnp.float32)
        hf = jnp.maximum(z2b * a2 + b2s, 0.0)
        h = hf.astype(jnp.bfloat16)

    h_bf = hf.astype(jnp.bfloat16)
    pool01 = (graph_pool > 0).astype(jnp.bfloat16)
    cnt = jnp.maximum(jnp.sum((graph_pool > 0).astype(jnp.float32), axis=1,
                              keepdims=True), 1.0)
    pool_scale = jnp.sum(graph_pool.astype(jnp.float32), axis=1, keepdims=True) / cnt
    hp = jnp.dot(pool01, h_bf, preferred_element_type=jnp.float32) * pool_scale
    hp_bf = hp.astype(jnp.bfloat16)

    cp, ap = params["critic"], params["actor"]
    tc = jnp.tanh(jnp.dot(hp_bf, cp["w1"].astype(jnp.bfloat16),
                          preferred_element_type=jnp.float32) + cp["b1"])
    v = jnp.dot(tc, cp["w2"], preferred_element_type=jnp.float32) + cp["b2"]

    cand_glob = (candidate.astype(jnp.int32)
                 + (jnp.arange(B, dtype=jnp.int32) * n_per)[:, None]).reshape(BJ)
    onehot = (cand_glob[:, None]
              == jnp.arange(N, dtype=jnp.int32)[None, :]).astype(jnp.bfloat16)
    cand_feat = jnp.dot(onehot, h_bf, preferred_element_type=jnp.float32)
    cand_bf = cand_feat.astype(jnp.bfloat16)
    hp_bot = jnp.dot(hp_bf, ap["w1_bot"].astype(jnp.bfloat16),
                     preferred_element_type=jnp.float32)
    rep = (jnp.arange(BJ)[:, None] // n_j == jnp.arange(B)[None, :]).astype(jnp.float32)
    hp_rep = jnp.dot(rep.astype(jnp.bfloat16), hp_bot.astype(jnp.bfloat16),
                     preferred_element_type=jnp.float32)
    hidden = jnp.tanh(jnp.dot(cand_bf, ap["w1_top"].astype(jnp.bfloat16),
                              preferred_element_type=jnp.float32) + hp_rep + ap["b1"])
    scores = jnp.dot(hidden, ap["w2"], preferred_element_type=jnp.float32) + ap["b2"]

    masked = jnp.where(mask.reshape(BJ, 1), -jnp.inf, scores).reshape(B, n_j)
    gmax = jnp.max(masked, axis=1, keepdims=True)
    gmax = jnp.where(gmax > -jnp.inf, gmax, 0.0)
    e = jnp.exp(masked - gmax)
    pi = e / jnp.maximum(jnp.sum(e, axis=1, keepdims=True), 1e-30)
    return pi.reshape(B, n_j, 1), v


# --------------------------- parameter init ----------------------------------

def _linear_init(key, fan_in, fan_out):
    kw, kb = jax.random.split(key)
    bound = 1.0 / float(fan_in) ** 0.5
    w = jax.random.uniform(kw, (fan_in, fan_out), jnp.float32, -bound, bound)
    b = jax.random.uniform(kb, (1, fan_out), jnp.float32, -bound, bound)
    return w, b


def init_params(key, input_dim, hidden_dim, num_layers, hidden_dim_actor, hidden_dim_critic):
    keys = jax.random.split(key, num_layers + 4)
    gin = []
    din = input_dim
    for l in range(num_layers - 1):
        k1, k2 = jax.random.split(keys[l])
        w1, b1 = _linear_init(k1, din, hidden_dim)
        w2, b2 = _linear_init(k2, hidden_dim, hidden_dim)
        gin.append(dict(
            w1=w1, b1=b1,
            g1=jnp.ones((1, hidden_dim), jnp.float32),
            be1=jnp.zeros((1, hidden_dim), jnp.float32),
            w2=w2, b2=b2,
            g2=jnp.ones((1, hidden_dim), jnp.float32),
            be2=jnp.zeros((1, hidden_dim), jnp.float32),
        ))
        din = hidden_dim
    wa1, ba1 = _linear_init(keys[num_layers], 2 * hidden_dim, hidden_dim_actor)
    wa2, ba2 = _linear_init(keys[num_layers + 1], hidden_dim_actor, 1)
    actor = dict(w1_top=wa1[:hidden_dim], w1_bot=wa1[hidden_dim:],
                 b1=ba1, w2=wa2, b2=ba2)
    wc1, bc1 = _linear_init(keys[num_layers + 2], hidden_dim, hidden_dim_critic)
    wc2, bc2 = _linear_init(keys[num_layers + 3], hidden_dim_critic, 1)
    critic = dict(w1=wc1, b1=bc1, w2=wc2, b2=bc2)
    return dict(gin=gin, actor=actor, critic=critic)


# --------------------------------- main --------------------------------------

if __name__ == "__main__":
    B, n_j, n_m = 2, 8, 10             # 2 graphs, 8 jobs x 10 machines
    n_per = n_j * n_m                  # nodes per graph (80)
    N = B * n_per                      # total nodes (160; not a tile multiple -> padding path)
    input_dim = 2
    hidden_dim = 128
    hidden_dim_actor = hidden_dim_critic = 128
    num_layers = 3                     # -> 2 GIN layers

    key = jax.random.PRNGKey(0)
    kx, kadj, kp = jax.random.split(key, 3)

    x = jax.random.normal(kx, (N, input_dim), jnp.float32)

    # block-diagonal adjacency (per graph) with self loops
    graph_id = jnp.arange(N) // n_per
    same_graph = (graph_id[:, None] == graph_id[None, :]).astype(jnp.float32)
    rand_edges = (jax.random.uniform(kadj, (N, N)) < 0.2).astype(jnp.float32)
    adj = jnp.minimum(rand_edges * same_graph + jnp.eye(N, dtype=jnp.float32), 1.0)

    # average graph-pooling matrix [B, N]
    graph_pool = (jnp.arange(B)[:, None] == graph_id[None, :]).astype(jnp.float32) / n_per

    # candidate = first operation of each job (local node index within each graph)
    candidate = jnp.tile(jnp.arange(n_j, dtype=jnp.int32)[None, :] * n_m, (B, 1))
    # mask: mask out last job of graph 0
    mask = jnp.zeros((B, n_j), dtype=bool).at[0, n_j - 1].set(True)

    params = init_params(kp, input_dim, hidden_dim, num_layers,
                         hidden_dim_actor, hidden_dim_critic)

    # row_tile=128 forces 2 row tiles: exercises cross-tile BN partials, padded-row
    # masking and the accumulating heads kernel even on big-VMEM chips.
    pi, v = actor_critic_forward(params, x, n_j, graph_pool, None, adj, candidate, mask,
                                 row_tile=128)
    jax.block_until_ready((pi, v))

    pi_ref, v_ref = reference_forward(params, x, graph_pool, adj, candidate, mask)
    jax.block_until_ready((pi_ref, v_ref))

    assert pi.shape == (B, n_j, 1) and v.shape == (B, 1)
    assert bool(jnp.all(jnp.isfinite(pi))) and bool(jnp.all(jnp.isfinite(v)))
    sums = jnp.sum(pi[:, :, 0], axis=1)
    assert jnp.allclose(sums, 1.0, atol=1e-4), sums
    assert float(pi[0, n_j - 1, 0]) <= 1e-6               # masked candidate -> zero prob
    assert jnp.allclose(pi, pi_ref, atol=5e-3), float(jnp.max(jnp.abs(pi - pi_ref)))
    assert jnp.allclose(v, v_ref, atol=5e-3, rtol=2e-2), float(jnp.max(jnp.abs(v - v_ref)))
    print("KERNEL_OK")
</pallas_src>

<mosaic_0001>
module attributes {stable_mosaic.version = 11 : i64} {
  func.func @gin_agg_mlp1_kernel(%arg0: i32, %arg1: memref<128x256xbf16, #tpu.memory_space<vmem>>, %arg2: memref<256x128xbf16, #tpu.memory_space<vmem>>, %arg3: memref<128x128xbf16, #tpu.memory_space<vmem>>, %arg4: memref<1x128xf32, #tpu.memory_space<vmem>>, %arg5: memref<128x128xbf16, #tpu.memory_space<vmem>>, %arg6: memref<1x1x128xf32, #tpu.memory_space<vmem>>, %arg7: memref<1x1x128xf32, #tpu.memory_space<vmem>>) attributes {dimension_semantics = [#tpu.dimension_semantics<parallel>], iteration_bounds = array<i64: 2>, scalar_prefetch = 0 : i64, scratch_operands = 0 : i64, tpu.core_type = #tpu.core_type<tc>, window_params = [{transform_indices = @transform_0, window_bounds = array<i64: 128, 256>}, {pipeline_mode = #tpu.pipeline_mode<synchronous>, transform_indices = @transform_1, window_bounds = array<i64: 256, 128>}, {pipeline_mode = #tpu.pipeline_mode<synchronous>, transform_indices = @transform_2, window_bounds = array<i64: 128, 128>}, {pipeline_mode = #tpu.pipeline_mode<synchronous>, transform_indices = @transform_3, window_bounds = array<i64: 1, 128>}, {transform_indices = @transform_4, window_bounds = array<i64: 128, 128>}, {transform_indices = @transform_5, window_bounds = array<i64: 1, 1, 128>}, {transform_indices = @transform_6, window_bounds = array<i64: 1, 1, 128>}]} {
    %c0 = arith.constant 0 : index
    %c0_0 = arith.constant 0 : index
    %0 = vector.load %arg1[%c0, %c0_0] : memref<128x256xbf16, #tpu.memory_space<vmem>>, vector<128x256xbf16>
    %c0_1 = arith.constant 0 : index
    %c0_2 = arith.constant 0 : index
    %1 = vector.load %arg2[%c0_1, %c0_2] : memref<256x128xbf16, #tpu.memory_space<vmem>>, vector<256x128xbf16>
    %cst = arith.constant dense<0.000000e+00> : vector<128x128xf32>
    %2 = tpu.matmul %0, %1, %cst {dimension_numbers = #tpu.dot_dimension_numbers<[1], [0], [0], [1], [0, 0, 1, 1], [], []>} : vector<128x256xbf16>, vector<256x128xbf16>, vector<128x128xf32> -> vector<128x128xf32>
    %3 = arith.truncf %2 : vector<128x128xf32> to vector<128x128xbf16>
    %c0_3 = arith.constant 0 : index
    %c0_4 = arith.constant 0 : index
    %4 = vector.load %arg3[%c0_3, %c0_4] : memref<128x128xbf16, #tpu.memory_space<vmem>>, vector<128x128xbf16>
    %cst_5 = arith.constant dense<0.000000e+00> : vector<128x128xf32>
    %5 = tpu.matmul %3, %4, %cst_5 {dimension_numbers = #tpu.dot_dimension_numbers<[1], [0], [0], [1], [0, 0, 1, 1], [], []>} : vector<128x128xbf16>, vector<128x128xbf16>, vector<128x128xf32> -> vector<128x128xf32>
    %c0_6 = arith.constant 0 : index
    %c0_7 = arith.constant 0 : index
    %6 = vector.load %arg4[%c0_6, %c0_7] : memref<1x128xf32, #tpu.memory_space<vmem>>, vector<1x128xf32>
    %7 = vector.broadcast %6 : vector<1x128xf32> to vector<128x128xf32>
    %8 = arith.addf %5, %7 : vector<128x128xf32>
    %9 = arith.truncf %8 : vector<128x128xf32> to vector<128x128xbf16>
    %c0_8 = arith.constant 0 : index
    %c0_9 = arith.constant 0 : index
    %10 = vector.load %arg5[%c0_8, %c0_9] : memref<128x128xbf16, #tpu.memory_space<vmem>>, vector<128x128xbf16>
    tpu.vector_store %arg5[%c0_8, %c0_9], %9 {strides = array<i32>} : memref<128x128xbf16, #tpu.memory_space<vmem>>, vector<128x128xbf16>,
    %c128_i32 = arith.constant 128 : i32
    %11 = arith.muli %arg0, %c128_i32 : i32
    %12 = tpu.iota {dimensions = array<i32: 0>} : vector<128x1xi32>
    %13 = vector.broadcast %11 : i32 to vector<128x1xi32>
    %14 = arith.addi %12, %13 : vector<128x1xi32>
    %c160_i32 = arith.constant 160 : i32
    %15 = vector.broadcast %c160_i32 : i32 to vector<128x1xi32>
    %16 = arith.cmpi slt, %14, %15 : vector<128x1xi32>
    %17 = arith.extui %16 : vector<128x1xi1> to vector<128x1xi32>
    %18 = arith.sitofp %17 : vector<128x1xi32> to vector<128x1xf32>
    %19 = vector.broadcast %18 : vector<128x1xf32> to vector<128x128xf32>
    %20 = arith.mulf %8, %19 : vector<128x128xf32>
    %cst_10 = arith.constant dense<0.000000e+00> : vector<128xf32>
    %21 = vector.multi_reduction <add>, %20, %cst_10 [0] : vector<128x128xf32> to vector<128xf32>
    %22 = vector.shape_cast %21 : vector<128xf32> to vector<1x128xf32>
    %c0_11 = arith.constant 0 : index
    %c0_12 = arith.constant 0 : index
    %c0_13 = arith.constant 0 : index
    %23 = vector.load %arg6[%c0_11, %c0_12, %c0_13] : memref<1x1x128xf32, #tpu.memory_space<vmem>>, vector<1x1x128xf32>
    %24 = vector.shape_cast %23 : vector<1x1x128xf32> to vector<1x128xf32>
    %25 = vector.shape_cast %22 : vector<1x128xf32> to vector<1x1x128xf32>
    tpu.vector_store %arg6[%c0_11, %c0_12, %c0_13], %25 {strides = array<i32>} : memref<1x1x128xf32, #tpu.memory_space<vmem>>, vector<1x1x128xf32>,
    %26 = arith.mulf %20, %8 : vector<128x128xf32>
    %cst_14 = arith.constant dense<0.000000e+00> : vector<128xf32>
    %27 = vector.multi_reduction <add>, %26, %cst_14 [0] : vector<128x128xf32> to vector<128xf32>
    %28 = vector.shape_cast %27 : vector<128xf32> to vector<1x128xf32>
    %c0_15 = arith.constant 0 : index
    %c0_16 = arith.constant 0 : index
    %c0_17 = arith.constant 0 : index
    %29 = vector.load %arg7[%c0_15, %c0_16, %c0_17] : memref<1x1x128xf32, #tpu.memory_space<vmem>>, vector<1x1x128xf32>
    %30 = vector.shape_cast %29 : vector<1x1x128xf32> to vector<1x128xf32>
    %31 = vector.shape_cast %28 : vector<1x128xf32> to vector<1x1x128xf32>
    tpu.vector_store %arg7[%c0_15, %c0_16, %c0_17], %31 {strides = array<i32>} : memref<1x1x128xf32, #tpu.memory_space<vmem>>, vector<1x1x128xf32>,
    return
  }
  func.func @transform_0(%arg0: i32) -> (i32, i32) {
    %c0_i32 = arith.constant 0 : i32
    %c0_i32_0 = arith.constant 0 : i32
    return %arg0, %c0_i32 : i32, i32
  }
  func.func @transform_1(%arg0: i32) -> (i32, i32) {
    %c0_i32 = arith.constant 0 : i32
    %c0_i32_0 = arith.constant 0 : i32
    %c0_i32_1 = arith.constant 0 : i32
    return %c0_i32, %c0_i32_0 : i32, i32
  }
  func.func @transform_2(%arg0: i32) -> (i32, i32) {
    %c0_i32 = arith.constant 0 : i32
    %c0_i32_0 = arith.constant 0 : i32
    %c0_i32_1 = arith.constant 0 : i32
    return %c0_i32, %c0_i32_0 : i32, i32
  }
  func.func @transform_3(%arg0: i32) -> (i32, i32) {
    %c0_i32 = arith.constant 0 : i32
    %c0_i32_0 = arith.constant 0 : i32
    %c0_i32_1 = arith.constant 0 : i32
    return %c0_i32, %c0_i32_0 : i32, i32
  }
  func.func @transform_4(%arg0: i32) -> (i32, i32) {
    %c0_i32 = arith.constant 0 : i32
    %c0_i32_0 = arith.constant 0 : i32
    return %arg0, %c0_i32 : i32, i32
  }
  func.func @transform_5(%arg0: i32) -> (i32, i32, i32) {
    %c0_i32 = arith.constant 0 : i32
    %c0_i32_0 = arith.constant 0 : i32
    %c0_i32_1 = arith.constant 0 : i32
    return %arg0, %c0_i32, %c0_i32_0 : i32, i32, i32
  }
  func.func @transform_6(%arg0: i32) -> (i32, i32, i32) {
    %c0_i32 = arith.constant 0 : i32
    %c0_i32_0 = arith.constant 0 : i32
    %c0_i32_1 = arith.constant 0 : i32
    return %arg0, %c0_i32, %c0_i32_0 : i32, i32, i32
  }
}

</mosaic_0001>

<bundles_post_ra>
// kernel: tpu_custom_call.1
= control target key start
LH: loop header
LB: loop body
LE: loop exit
PB: predicated region body
PF: predicated region fallthrough
CT: control target
= control target key end

     0   :  { %12 = vsyncpa [#allocation3], 0  ;;  %s2200_s0 = inlined_call_operand.hbm [shape: bf16[256,256], index: 0, kind: input, shape index: {}]   ;;  %s2201_s1 = inlined_call_operand.hbm [shape: bf16[256,128], index: 1, kind: input, shape index: {}]   ;;  %s2202_s2 = inlined_call_operand.hbm [shape: bf16[128,128], index: 2, kind: input, shape index: {}]   ;;  %s2203_s3 = inlined_call_operand.vmem [shape: f32[1,128], index: 3, kind: input, shape index: {}]   ;;  %s2204_s4 = inlined_call_operand.hbm [shape: bf16[256,128], index: 4, kind: output, shape index: {0}]   ;;  %s2205_s5 = inlined_call_operand.hbm [shape: f32[2,1,128], index: 5, kind: output, shape index: {1}]   ;;  %s2206_s6 = inlined_call_operand.hbm [shape: f32[2,1,128], index: 6, kind: output, shape index: {2}]  }
   0x1   :  { %14 = vsyncpa [#allocation3 + $0x1], 0 }
   0x2   :  { %15 = vsyncpa [#allocation6], 0 }
   0x3   :  { %16 = vsyncpa [#allocation4], 0 }
   0x4   :  { %18 = vsyncpa [#allocation4 + $0x1], 0 }
   0x5   :  { %19 = vsyncpa [#allocation10], 0 }
   0x6   :  { %21 = vsyncpa [#allocation10 + $0x1], 0  ;;  %s1818_s21 = smov 0   ;;  %s1820_s22 = smov 0  }
   0x7   :  { %s1822_s23 = smov 0   ;;  %s1824_s24 = smov 0  }
   0x8 LB: > { %s1839_s25 = sadd.s32 4294967295, %s1772_s24   ;;  %s2207_s26 = sadd.s32 4294967294, %s1772_s24   ;;  %s1772_s24 = sphi %s1824_s24, %s2218_s24   ;;  %s1768_s23 = sphi %s1822_s23, %s2217_s23   ;;  %s1764_s22 = sphi %s1820_s22, %s2216_s22   ;;  %s1760_s21 = sphi %s1818_s21, %s2215_s21  }
   0x9   : > { %p47_p0 = scmp.ne.s32.totalorder %s1764_s22, %s1760_s21  ;;  %p48_p1 = scmp.eq.s32.totalorder %s1839_s25, 0 }
   0xa   : > { %p134_p2 = scmp.eq.s32.totalorder %s1839_s25, 1  ;;  %p140_p3 = scmp.eq.s32.totalorder %s2207_s26, 1 }
   0xb   : > { %p1850_p4 = por %p48_p1, %p47_p0  ;;  %p1158_p5 = scmp.ge.s32.totalorder %s1772_s24, 1 }
   0xc   : > { %p1855_p6 = por %p140_p3, %p47_p0  ;;  %p199_p7 = scmp.lt.s32.totalorder %s1772_s24, 3 }
   0xd   : > { %s210_s7 = sshll.u32 %s2201_s1, 4  ;;  %s1774_s9 = smov [#allocation5]   ;;  %s211_s7 = int_to_ptr.hbm [resolvable:$true] %s210_s7 }
   0xe   : > { %p1863_p8 = pnand %p1158_p5, %p199_p7  ;;  %s212_s10 = sshll.u32 %s1774_s9, 4  ;;  %s213_s10 = int_to_ptr.vmem [resolvable:$true] %s212_s10 }
   0xf   : > { %s224_s13 = sshll.u32 %s2202_s2, 4  ;;  %s1775_s14 = smov 64   ;;  %s225_s13 = int_to_ptr.hbm [resolvable:$true] %s224_s13 }
  0x10   : > { %p1483_p9 = pneg %p1863_p8  ;;  %s1776_s15 = smov 4  }
  0x11   : > { %s1777_s16 = smov [#allocation7]   ;;  %s1876_s18 = sadd.s32 1, %s1772_s24  }
  0x12   : > { %p1484_p10 = pnand %p1483_p9, %p48_p1  ;;  %s226_s17 = sshll.u32 %s1777_s16, 4  ;;  %s227_s17 = int_to_ptr.vmem [resolvable:$true] %s226_s17 }
  0x13   : > { %s34_s19 = sadd.s32 1, %s1768_s23  ;;  %s31_s20 = ssub.s32 %s1772_s24, %s1876_s18 }
  0x14   : > { %1486 = dma.hbm_to_vmem [thread:$0]  (!%p1484_p10), %s211_s7, 2048, %s213_s10, [#allocation6], %s1775_s14, %s1775_s14, %s1776_s15  }
  0x15   : > { %1489 = dma.hbm_to_vmem [thread:$0]  (!%p1484_p10), %s225_s13, 1024, %s227_s17, [#allocation6], %s1775_s14, %s1775_s14, %s1776_s15  }
  0x16   : > { %p41_p12 = scmp.ne.s32.totalorder %s1768_s23, %s1764_s22  ;;  %p32_p13 = scmp.eq.s32.totalorder %s31_s20, 0 }
  0x17   : > { %p42_p0 = scmp.eq.s32.totalorder %s1772_s24, 0  ;;  %p1506_p5 = scmp.lt.s32.totalorder %s1772_s24, 2 }
  0x18   : > { %p1886_p3 = por %p134_p2, %p41_p12  ;;  %s243_s7 = sand.u32 1, %s1768_s23  }
  0x19   : > { %s1892_s30 = scalar_select %p32_p13, %s1768_s23, %s34_s19  }
  0x1a   : > { %p43_p7 = por %p42_p0, %p41_p12  ;;  %s1162_s9 = sshll.u32 %s243_s7, 7 }
  0x1b   : > { %s1354_s10 = sshll.u32 %s1772_s24, 7  ;;  %s247_s14 = scalar_lea.vmem [#allocation2], %s1162_s9 }
  0x1c   : > { %s253_s13 = scalar_lea.hbm %s2200_s0, %s1354_s10  ;;  %s256_s15 = sshll.u32 %s247_s14, 4  ;;  %s257_s15 = int_to_ptr.vmem [resolvable:$true] %s256_s15 }
  0x1d   : > { %s254_s16 = sshll.u32 %s253_s13, 4  ;;  %p1899_p2 = pnand %p1506_p5, %p43_p7  ;;  %s255_s16 = int_to_ptr.hbm [resolvable:$true] %s254_s16 }
  0x1e   : > { %s244_s19 = scalar_lea.sflag [#allocation3], %s243_s7  ;;  %s1612_s20 = sshra.s32 %s255_s16, 4  ;;  %s1613_s20 = int_to_ptr.hbm [resolvable:$true] %s1612_s20 }
  0x1f   : > { %s1614_s26 = scalar_lea.hbm %s1613_s20, 128  ;;  %p1616_p10 = pneg %p1899_p2 }
  0x20   : > { %p1615_p9 = scmp.ne.s32.totalorder %s1613_s20, %s1614_s26  ;;  %s1619_s11 = scalar_lea.hbm %s2200_s0, 256 }
  0x21   : > { %p1620_p0 = scmp.lt.s32.totalorder %s1613_s20, %s2200_s0  ;;  %p1621_p5 = scmp.lt.s32.totalorder %s1619_s11, %s1614_s26 }
  0x22   : > { %p1617_p12 = pnand %p1616_p10, %p1615_p9 }
  0x23   : > { %p1622_p7 = por %p1621_p5, %p1620_p0 }
  0x24   : > { %p1618_p13 = pneg %p1617_p12 }
  0x26   : > { %p1623_p11 = pnand %p1622_p7, %p1618_p13 }
  0x28   : > { %1626 = shalt.err (!%p1623_p11)
}
  0x29   : > { %s1778_s7 = smov 128   ;;  %s1779_s14 = smov 8  }
  0x2a   : > { %1493 = dma.hbm_to_vmem [thread:$0]  (!%p1899_p2), %s255_s16, 2048, %s257_s15, %s244_s19, %s1778_s7, %s1778_s7, %s1779_s14  }
  0x2b   : > { %268 = sbr.rel (%p1863_p8) target bundleno = 483 (0x1e3), region = 36  ;;  %s1916_s10 = sand.u32 (!%p1863_p8), 1, %s1764_s22  }
  0x2c   : > { %s1167_s9 = sshll.u32 (!%p1863_p8), %s1916_s10, 7  ;;  %s271_s20 = scalar_lea.sflag (!%p1863_p8), [#allocation3], %s1916_s10 }
  0x2d   : > { %s1920_s26 = scalar_lea.vmem (!%p1863_p8), [#allocation2], %s1167_s9 }
  0x30   : > { %1743 = dma.done.wait (%p1850_p4), %s271_s20, 2048  }
  0x31   : > { %1745 = vsyncadd (%p1850_p4), %s271_s20, 4294965248 }
  0x32   : > { %1747 = dma.done.wait (%p48_p1), [#allocation6], 3072  }
  0x33   : > { %1749 = vsyncadd (%p48_p1), [#allocation6], 4294964224  ;;  %v1378_v0 = vld [vmem:[#allocation5 + $0x38] sm:$0xff]  ;;  %v1377_v2 = vld [vmem:[#allocation5 + $0x30] sm:$0xff]  ;;  %s1170_s15 = sshll.u32 %s1916_s10, 6  ;;  %s1331_s17 = sshll.u32 %s1839_s25, 7 }
  0x34   : > { %v1386_v1 = vld [vmem:[#allocation5 + $0x78] sm:$0xff]  ;;  %548 = vmatpush.bf16.msra.mxu0 %v1378_v0  ;;  %1443 = vmatpush.bf16.msra.mxu3 %v1378_v0  ;;  %v1385_v3 = vld [vmem:[#allocation5 + $0x70] sm:$0xff]  ;;  %v1376_v4 = vld [vmem:[#allocation5 + $0x28] sm:$0xff]  ;;  %s1976_s16 = scalar_lea.vmem [#allocation8], %s1170_s15  ;;  %s1395_s19 = sshll.u32 %s1839_s25, 6 }
  0x35   : > { %597 = vmatpush.bf16.msra.mxu1 %v1386_v1  ;;  %v1384_v5 = vld [vmem:[#allocation5 + $0x68] sm:$0xff]  ;;  %v1375_v6 = vld [vmem:[#allocation5 + $0x20] sm:$0xff]  ;;  %v1374_v8 = vld [vmem:[#allocation5 + $0x18] sm:$0xff]  ;;  %s982_s13 = scalar_lea.hbm %s2204_s4, %s1395_s19  ;;  %s983_s7 = sshll.u32 %s1976_s16, 4  ;;  %s2102_s7 = int_to_ptr.vmem [resolvable:$true] %s983_s7 }
  0x36   : > { %v1383_v7 = vld [vmem:[#allocation5 + $0x60] sm:$0xff]  ;;  %v1382_v9 = vld [vmem:[#allocation5 + $0x58] sm:$0xff]  ;;  %v1373_v10 = vld [vmem:[#allocation5 + $0x10] sm:$0xff]  ;;  %s985_s14 = sshll.u32 %s982_s13, 4  ;;  %s963_s9 = scalar_lea.sflag [#allocation4], %s1916_s10  ;;  %s2104_s14 = int_to_ptr.hbm [resolvable:$true] %s985_s14 }
  0x37   : > { %v1381_v11 = vld [vmem:[#allocation5 + $0x50] sm:$0xff]  ;;  %v1372_v12 = vld [vmem:[#allocation5 + $0x8] sm:$0xff]  ;;  %v1371_v14 = vld [vmem:[#allocation5] sm:$0xff]  ;;  %s1656_s20 = sshra.s32 %s2104_s14, 4  ;;  %s1662_s15 = scalar_lea.hbm %s2204_s4, 128  ;;  %s1657_s20 = int_to_ptr.hbm [resolvable:$true] %s1656_s20 }
  0x38   : > { %549 = vmatpush.bf16.msra.mxu0 %v1377_v2  ;;  %1444 = vmatpush.bf16.msra.mxu3 %v1377_v2  ;;  %v1380_v13 = vld [vmem:[#allocation5 + $0x48] sm:$0xff]  ;;  %v1173_v15 = vld [vmem:[%s1920_s26] sm:$0xf]  ;;  %v1355_v20 = vld [vmem:[%s1920_s26 + $0x4] sm:$0xf]  ;;  %p1663_p11 = scmp.lt.s32.totalorder %s1657_s20, %s2204_s4 }
  0x39   : > { %598 = vmatpush.bf16.msra.mxu1 %v1385_v3  ;;  %v1356_v16 = vld [vmem:[%s1920_s26 + $0x4] sm:$0xf0]  ;;  %v1221_v17 = vld [vmem:[%s1920_s26 + $0x60] sm:$0xf]  ;;  %v1175_v21 = vld [vmem:[%s1920_s26 + $0x8] sm:$0xf0] }
  0x3a   : > { %v1368_v18 = vld [vmem:[%s1920_s26 + $0x64] sm:$0xf0]  ;;  %v1379_v19 = vld [vmem:[#allocation5 + $0x40] sm:$0xff]  ;;  %v1174_v22 = vor.u32 %v1356_v16, %v1173_v15  ;;  %v1178_v24 = vor.u32 %v1355_v20, %v1175_v21  ;;  %v1181_v25 = vld [vmem:[%s1920_s26 + $0x10] sm:$0xf] }
  0x3b   : > { %v1222_v23 = vor.u32 %v1368_v18, %v1221_v17  ;;  %v1358_v26 = vld [vmem:[%s1920_s26 + $0x14] sm:$0xf0]  ;;  %v1229_v27 = vld [vmem:[%s1920_s26 + $0x70] sm:$0xf]  ;;  %v1357_v29 = vld [vmem:[%s1920_s26 + $0x14] sm:$0xf] }
  0x3c   : > { %550 = vmatpush.bf16.msra.mxu0 %v1376_v4  ;;  %1445 = vmatpush.bf16.msra.mxu3 %v1376_v4  ;;  %v1370_v28 = vld [vmem:[%s1920_s26 + $0x74] sm:$0xf0]  ;;  %v1183_v30 = vld [vmem:[%s1920_s26 + $0x18] sm:$0xf0]  ;;  %v1182_v31 = vor.u32 %v1358_v26, %v1181_v25  ;;  %v1189_v34 = vld [vmem:[%s1920_s26 + $0x20] sm:$0xf] }
  0x3d   : > { %599 = vmatpush.bf16.msra.mxu1 %v1384_v5  ;;  %v1230_v32 = vor.u32 %v1370_v28, %v1229_v27  ;;  %v1186_v33 = vor.u32 %v1357_v29, %v1183_v30  ;;  %v1360_v35 = vld [vmem:[%s1920_s26 + $0x24] sm:$0xf0]  ;;  %v1367_v36 = vld [vmem:[%s1920_s26 + $0x64] sm:$0xf]  ;;  %v1223_v37 = vld [vmem:[%s1920_s26 + $0x68] sm:$0xf0] }
  0x3e   : > { %v1359_v38 = vld [vmem:[%s1920_s26 + $0x24] sm:$0xf]  ;;  %v1191_v39 = vld [vmem:[%s1920_s26 + $0x28] sm:$0xf0]  ;;  %v1190_v40 = vor.u32 %v1360_v35, %v1189_v34  ;;  %v1226_v41 = vor.u32 %v1367_v36, %v1223_v37  ;;  %v1197_v43 = vld [vmem:[%s1920_s26 + $0x30] sm:$0xf] }
  0x3f   : > { %v1194_v42 = vor.u32 %v1359_v38, %v1191_v39  ;;  %v1362_v44 = vld [vmem:[%s1920_s26 + $0x34] sm:$0xf0]  ;;  %v1369_v45 = vld [vmem:[%s1920_s26 + $0x74] sm:$0xf]  ;;  %v1231_v46 = vld [vmem:[%s1920_s26 + $0x78] sm:$0xf0] }
  0x40   : > { %551 = vmatpush.bf16.msra.mxu0 %v1375_v6  ;;  %1446 = vmatpush.bf16.msra.mxu3 %v1375_v6  ;;  %v1361_v47 = vld [vmem:[%s1920_s26 + $0x34] sm:$0xf]  ;;  %v1199_v48 = vld [vmem:[%s1920_s26 + $0x38] sm:$0xf0]  ;;  %v1198_v49 = vor.u32 %v1362_v44, %v1197_v43  ;;  %v1234_v50 = vor.u32 %v1369_v45, %v1231_v46  ;;  %v1392_v54 = vld [vmem:[#allocation7 + $0x28] sm:$0xff] }
  0x41   : > { %600 = vmatpush.bf16.msra.mxu1 %v1383_v7  ;;  %v1202_v51 = vor.u32 %v1361_v47, %v1199_v48  ;;  %v1394_v52 = vld [vmem:[#allocation7 + $0x38] sm:$0xff]  ;;  %v1393_v53 = vld [vmem:[#allocation7 + $0x30] sm:$0xff]  ;;  %v1205_v55 = vld [vmem:[%s1920_s26 + $0x40] sm:$0xf] }
  0x42   : > { %722 = vmatpush.bf16.msra.mxu2 %v1394_v52  ;;  %v1364_v56 = vld [vmem:[%s1920_s26 + $0x44] sm:$0xf0]  ;;  %v1363_v57 = vld [vmem:[%s1920_s26 + $0x44] sm:$0xf]  ;;  %v1207_v58 = vld [vmem:[%s1920_s26 + $0x48] sm:$0xf0] }
  0x43   : > { %v1391_v59 = vld [vmem:[#allocation7 + $0x20] sm:$0xff]  ;;  %v1206_v60 = vor.u32 %v1364_v56, %v1205_v55  ;;  %v1210_v61 = vor.u32 %v1363_v57, %v1207_v58  ;;  %v1390_v62 = vld [vmem:[#allocation7 + $0x18] sm:$0xff]  ;;  %v1213_v63 = vld [vmem:[%s1920_s26 + $0x50] sm:$0xf] }
  0x44   : > { %552 = vmatpush.bf16.msra.mxu0 %v1374_v8  ;;  %1447 = vmatpush.bf16.msra.mxu3 %v1374_v8  ;;  %v1366_v0 = vld [vmem:[%s1920_s26 + $0x54] sm:$0xf0]  ;;  %v1215_v2 = vld [vmem:[%s1920_s26 + $0x58] sm:$0xf0]  ;;  %v1388_v6 = vld [vmem:[#allocation7 + $0x8] sm:$0xff] }
  0x45   : > { %601 = vmatpush.bf16.msra.mxu1 %v1382_v9 }
  0x46   : > { %723 = vmatpush.bf16.msra.mxu2 %v1393_v53 }
  0x48   : > { %553 = vmatpush.bf16.msra.mxu0 %v1373_v10  ;;  %1448 = vmatpush.bf16.msra.mxu3 %v1373_v10 }
  0x49   : > { %602 = vmatpush.bf16.msra.mxu1 %v1381_v11 }
  0x4a   : > { %724 = vmatpush.bf16.msra.mxu2 %v1392_v54 }
  0x4c   : > { %554 = vmatpush.bf16.msra.mxu0 %v1372_v12  ;;  %1449 = vmatpush.bf16.msra.mxu3 %v1372_v12 }
  0x4d   : > { %603 = vmatpush.bf16.msra.mxu1 %v1380_v13 }
  0x4e   : > { %725 = vmatpush.bf16.msra.mxu2 %v1391_v59 }
  0x50   : > { %555 = vmatpush.bf16.msra.mxu0 %v1371_v14  ;;  %1450 = vmatpush.bf16.msra.mxu3 %v1371_v14 }
  0x51   : > { %604 = vmatpush.bf16.msra.mxu1 %v1379_v19 }
  0x52   : > { %726 = vmatpush.bf16.msra.mxu2 %v1390_v62 }
  0x53   : > { %556 = vmatmul.bf16.vlgmr.msra.gmra.mxu0 %v1174_v22  ;;  %586 = vmatmul.bf16.vlgmr.msra.gmra.mxu3 %v1222_v23 }
  0x54   : > { %1451 = vmatpush.bf16.msrb.mxu3 %v1386_v1  ;;  %605 = vmatmul.bf16.vlgmr.msra.gmra.mxu1 %v1178_v24  ;;  %v1365_v1 = vld [vmem:[%s1920_s26 + $0x54] sm:$0xf]  ;;  %s1658_s26 = scalar_lea.hbm %s1657_s20, 64 }
  0x55   : > { %v1218_v4 = vor.u32 %v1365_v1, %v1215_v2  ;;  %v1965_v1 = vld [vmem:[%s2203_s3] ss:$0 sm:$0xff]  ;;  %p1659_p1 = scmp.ne.s32.totalorder %s1657_s20, %s1658_s26  ;;  %p1664_p2 = scmp.lt.s32.totalorder %s1662_s15, %s1658_s26 }
  0x57   : > { %p1660_p4 = pnand %p1659_p1, %p1886_p3  ;;  %p1665_p9 = por %p1664_p2, %p1663_p11 }
  0x58   : > { %1452 = vmatpush.bf16.msrb.mxu3 %v1385_v3  ;;  %v1214_v3 = vor.u32 %v1366_v0, %v1213_v63 }
  0x59   : > { %p1661_p8 = pneg %p1660_p4 }
  0x5b   : > { %p1666_p10 = pnand %p1665_p9, %p1661_p8 }
  0x5c   : > { %1453 = vmatpush.bf16.msrb.mxu3 %v1384_v5  ;;  %v1389_v5 = vld [vmem:[#allocation7 + $0x10] sm:$0xff] }
  0x5d   : > { %727 = vmatpush.bf16.msra.mxu2 %v1389_v5 }
  0x60   : > { %1454 = vmatpush.bf16.msrb.mxu3 %v1383_v7  ;;  %v1387_v7 = vld [vmem:[#allocation7] sm:$0xff] }
  0x61   : > { %728 = vmatpush.bf16.msra.mxu2 %v1388_v6 }
  0x63   : > { %561 = vmatmul.bf16.gmra.mxu0 %v1182_v31  ;;  %591 = vmatmul.bf16.gmra.mxu3 %v1230_v32 }
  0x64   : > { %1455 = vmatpush.bf16.msrb.mxu3 %v1382_v9  ;;  %610 = vmatmul.bf16.gmra.mxu1 %v1186_v33 }
  0x65   : > { %729 = vmatpush.bf16.msra.mxu2 %v1387_v7 }
  0x68   : > { %1456 = vmatpush.bf16.msrb.mxu3 %v1381_v11 }
  0x6c   : > { %1457 = vmatpush.bf16.msrb.mxu3 %v1380_v13 }
  0x70   : > { %1458 = vmatpush.bf16.msrb.mxu3 %v1379_v19 }
  0x73   : > { %566 = vmatmul.bf16.gmra.mxu0 %v1190_v40  ;;  %635 = vmatmul.bf16.vlgmr.msrb.gmra.mxu3 %v1226_v41 }
  0x74   : > { %615 = vmatmul.bf16.gmra.mxu1 %v1194_v42  ;;  %1459 = vmatpush.bf16.msra.mxu3 %v1394_v52 }
  0x78   : > { %1460 = vmatpush.bf16.msra.mxu3 %v1393_v53 }
  0x7c   : > { %1461 = vmatpush.bf16.msra.mxu3 %v1392_v54 }
  0x80   : > { %1462 = vmatpush.bf16.msra.mxu3 %v1391_v59 }
  0x83   : > { %571 = vmatmul.bf16.gmra.mxu0 %v1198_v49  ;;  %640 = vmatmul.bf16.gmra.mxu3 %v1234_v50 }
  0x84   : > { %620 = vmatmul.bf16.gmra.mxu1 %v1202_v51  ;;  %1463 = vmatpush.bf16.msra.mxu3 %v1390_v62 }
  0x88   : > { %1464 = vmatpush.bf16.msra.mxu3 %v1389_v5 }
  0x8c   : > { %1465 = vmatpush.bf16.msra.mxu3 %v1388_v6 }
  0x90   : > { %1466 = vmatpush.bf16.msra.mxu3 %v1387_v7 }
  0x93   : > { %576 = vmatmul.bf16.gmra.mxu0 %v1206_v60 }
  0x94   : > { %625 = vmatmul.bf16.gmra.mxu1 %v1210_v61 }
  0xa3   : > { %581 = vmatmul.bf16.gmra.mxu0 %v1214_v3 }
  0xa4   : > { %630 = vmatmul.bf16.gmra.mxu1 %v1218_v4 }
  0xd0   : > { %v557_v8 = vpop.f32.mrf.mxu0 }
  0xd1   : > { %v606_v9 = vpop.f32.mrf.mxu1 }
  0xd2   : > { %v607_v13 = vadd.f32 %v606_v9, %v557_v8 }
  0xd6   : > { %v587_v10 = vpop.f32.mrf.mxu3 }
  0xd8   : > { %v559_v11 = vpop.f32.mrf.mxu0 }
  0xd9   : > { %v608_v12 = vpop.f32.mrf.mxu1 }
  0xda   : > { %v609_v14 = vadd.f32 %v608_v12, %v559_v11 }
  0xdc   : > { %v646_v15 = vpack.c.bf16 %v609_v14, %v607_v13 }
  0xde   : > { %730 = vmatmul.bf16.vlgmr.msra.gmra.mxu2 %v646_v15  ;;  %v589_v16 = vpop.f32.mrf.mxu3 }
  0xe0   : > { %v562_v17 = vpop.f32.mrf.mxu0 }
  0xe1   : > { %v611_v18 = vpop.f32.mrf.mxu1 }
  0xe2   : > { %v612_v22 = vadd.f32 %v611_v18, %v562_v17  ;;  %v804_v18 = vlaneseq }
  0xe6   : > { %v592_v19 = vpop.f32.mrf.mxu3 }
  0xe8   : > { %v564_v20 = vpop.f32.mrf.mxu0 }
  0xe9   : > { %v613_v21 = vpop.f32.mrf.mxu1 }
  0xea   : > { %v614_v23 = vadd.f32 %v613_v21, %v564_v20 }
  0xec   : > { %v647_v24 = vpack.c.bf16 %v614_v23, %v612_v22  ;;  %v2005_v23 = vshrl.u32 %v804_v18, 7 }
  0xee   : > { %735 = vmatmul.bf16.gmra.mxu2 %v647_v24  ;;  %v594_v25 = vpop.f32.mrf.mxu3  ;;  %v806_v24 = vadd.s32 8, %v2005_v23  ;;  %v817_v18 = vadd.s32 96, %v2005_v23 }
  0xf0   : > { %v567_v26 = vpop.f32.mrf.mxu0 }
  0xf1   : > { %v616_v27 = vpop.f32.mrf.mxu1 }
  0xf2   : > { %v617_v31 = vadd.f32 %v616_v27, %v567_v26  ;;  %v2010_v26 = vstv %s1331_s17  ;;  %v807_v27 = vadd.s32 16, %v2005_v23 }
  0xf6   : > { %v636_v28 = vpop.f32.mrf.mxu3 }
  0xf7   : > { %v637_v35 = vadd.f32 %v636_v28, %v587_v10  ;;  %v823_v28 = vadd.s32 %v2010_v26, %v806_v24 }
  0xf8   : > { %v569_v29 = vpop.f32.mrf.mxu0 }
  0xf9   : > { %v618_v30 = vpop.f32.mrf.mxu1  ;;  %vm839_vm0 = vcmp.lt.s32.totalorder %v823_v28, 160 }
  0xfa   : > { %v619_v32 = vadd.f32 %v618_v30, %v569_v29  ;;  %v808_v29 = vadd.s32 24, %v2005_v23 }
  0xfc   : > { %v648_v33 = vpack.c.bf16 %v619_v32, %v617_v31  ;;  %v822_v31 = vadd.s32 %v2010_v26, %v2005_v23 }
  0xfe   : > { %740 = vmatmul.bf16.gmra.mxu2 %v648_v33  ;;  %v638_v34 = vpop.f32.mrf.mxu3  ;;  %vm838_vm1 = vcmp.lt.s32.totalorder %v822_v31, 160 }
  0xff   : > { %v639_v36 = vadd.f32 %v638_v34, %v589_v16  ;;  %v824_v34 = vadd.s32 %v2010_v26, %v807_v27 }
 0x100   : > { %v572_v37 = vpop.f32.mrf.mxu0 }
 0x101   : > { %v652_v38 = vpack.c.bf16 %v639_v36, %v637_v35  ;;  %v621_v39 = vpop.f32.mrf.mxu1  ;;  %v809_v35 = vadd.s32 32, %v2005_v23  ;;  %vm840_vm2 = vcmp.lt.s32.totalorder %v824_v34, 160  ;;  %v834_v34 = vadd.s32 %v2010_v26, %v817_v18 }
 0x102   : > { %v622_v43 = vadd.f32 %v621_v39, %v572_v37  ;;  %v825_v37 = vadd.s32 %v2010_v26, %v808_v29  ;;  %v811_v39 = vadd.s32 48, %v2005_v23 }
 0x103   : > { %760 = vmatmul.bf16.vlgmr.msra.gmra.mxu3 %v652_v38  ;;  %v810_v38 = vadd.s32 40, %v2005_v23  ;;  %vm850_vm11 = vcmp.lt.s32.totalorder %v834_v34, 160 }
 0x104   : > { %vm841_vm3 = vcmp.lt.s32.totalorder %v825_v37, 160 }
 0x106   : > { %v641_v40 = vpop.f32.mrf.mxu3 }
 0x107   : > { %v642_v47 = vadd.f32 %v641_v40, %v592_v19 }
 0x108   : > { %v574_v41 = vpop.f32.mrf.mxu0 }
 0x109   : > { %v623_v42 = vpop.f32.mrf.mxu1 }
 0x10a   : > { %v624_v44 = vadd.f32 %v623_v42, %v574_v41  ;;  %v826_v41 = vadd.s32 %v2010_v26, %v809_v35 }
 0x10c   : > { %v649_v45 = vpack.c.bf16 %v624_v44, %v622_v43  ;;  %v1780_v44 = vmov 0.0   ;;  %vm842_vm4 = vcmp.lt.s32.totalorder %v826_v41, 160  ;;  %v819_v41 = vadd.s32 112, %v2005_v23 }
 0x10e   : > { %745 = vmatmul.bf16.gmra.mxu2 %v649_v45  ;;  %v643_v46 = vpop.f32.mrf.mxu3  ;;  %v1333_v45 = vsel %vm839_vm0, 1.0, %v1780_v44 }
 0x10f   : > { %v644_v48 = vadd.f32 %v643_v46, %v594_v25  ;;  %v1332_v46 = vsel %vm838_vm1, 1.0, %v1780_v44 }
 0x110   : > { %v577_v49 = vpop.f32.mrf.mxu0 }
 0x111   : > { %v626_v50 = vpop.f32.mrf.mxu1  ;;  %v653_v51 = vpack.c.bf16 %v644_v48, %v642_v47  ;;  %v827_v47 = vadd.s32 %v2010_v26, %v810_v38 }
 0x112   : > { %v627_v54 = vadd.f32 %v626_v50, %v577_v49  ;;  %v1334_v50 = vsel %vm840_vm2, 1.0, %v1780_v44 }
 0x113   : > { %765 = vmatmul.bf16.gmra.mxu3 %v653_v51  ;;  %v828_v51 = vadd.s32 %v2010_v26, %v811_v39  ;;  %vm843_vm5 = vcmp.lt.s32.totalorder %v827_v47, 160 }
 0x115   : > { %vm844_vm6 = vcmp.lt.s32.totalorder %v828_v51, 160  ;;  %v820_v51 = vadd.s32 120, %v2005_v23 }
 0x118   : > { %v579_v52 = vpop.f32.mrf.mxu0 }
 0x119   : > { %v628_v53 = vpop.f32.mrf.mxu1 }
 0x11a   : > { %v629_v55 = vadd.f32 %v628_v53, %v579_v52  ;;  %v812_v52 = vadd.s32 56, %v2005_v23 }
 0x11c   : > { %v650_v56 = vpack.c.bf16 %v629_v55, %v627_v54  ;;  %v1335_v55 = vsel %vm841_vm3, 1.0, %v1780_v44 }
 0x11e   : > { %750 = vmatmul.bf16.gmra.mxu2 %v650_v56  ;;  %v813_v56 = vadd.s32 64, %v2005_v23 }
 0x120   : > { %v582_v57 = vpop.f32.mrf.mxu0 }
 0x121   : > { %v631_v58 = vpop.f32.mrf.mxu1 }
 0x122   : > { %v632_v61 = vadd.f32 %v631_v58, %v582_v57  ;;  %v1336_v58 = vsel %vm842_vm4, 1.0, %v1780_v44 }
 0x128   : > { %v584_v59 = vpop.f32.mrf.mxu0 }
 0x129   : > { %v633_v60 = vpop.f32.mrf.mxu1 }
 0x12a   : > { %v634_v62 = vadd.f32 %v633_v60, %v584_v59  ;;  %v829_v59 = vadd.s32 %v2010_v26, %v812_v52  ;;  %v814_v60 = vadd.s32 72, %v2005_v23 }
 0x12c   : > { %v651_v63 = vpack.c.bf16 %v634_v62, %v632_v61  ;;  %vm845_vm7 = vcmp.lt.s32.totalorder %v829_v59, 160 }
 0x12d   : > { %v1339_v29 = vsel %vm845_vm7, 1.0, %v1780_v44 }
 0x12e   : > { %755 = vmatmul.bf16.gmra.mxu2 %v651_v63 }
 0x161   : > { %v731_v0 = vpop.f32.mrf.mxu2 }
 0x162   : > { %v1969_v3 = vadd.f32 %v1965_v1, %v731_v0  ;;  %v1337_v0 = vsel %vm843_vm5, 1.0, %v1780_v44 }
 0x164   : > { %v886_v54 = vmul.f32 %v1332_v46, %v1969_v3 }
 0x166   : > { %v924_v63 = vmul.f32 %v886_v54, %v1969_v3 }
 0x169   : > { %v733_v2 = vpop.f32.mrf.mxu2 }
 0x16a   : > { %v1972_v4 = vadd.f32 %v1965_v1, %v733_v2  ;;  %v830_v2 = vadd.s32 %v2010_v26, %v813_v56 }
 0x16c   : > { %v1399_v5 = vpack.c.bf16 %v1972_v4, %v1969_v3  ;;  %v887_v53 = vmul.f32 %v1333_v45, %v1972_v4  ;;  %vm846_vm8 = vcmp.lt.s32.totalorder %v830_v2, 160 }
 0x16e   : > { %1400 = vst [vmem:[%s1976_s16] sm:$0xff] %v1399_v5   ;;  %v925_v61 = vmul.f32 %v887_v53, %v1972_v4  ;;  %v815_v5 = vadd.s32 80, %v2005_v23 }
 0x170   : > { %v832_v24 = vadd.s32 %v2010_v26, %v815_v5 }
 0x171   : > { %v736_v6 = vpop.f32.mrf.mxu2 }
 0x172   : > { %v1980_v8 = vadd.f32 %v1965_v1, %v736_v6  ;;  %v902_v6 = vadd.f32 %v887_v53, %v886_v54  ;;  %vm848_vm10 = vcmp.lt.s32.totalorder %v832_v24, 160 }
 0x173   : > { %v1342_v52 = vsel %vm848_vm10, 1.0, %v1780_v44 }
 0x174   : > { %v888_v57 = vmul.f32 %v1334_v50, %v1980_v8 }
 0x179   : > { %v738_v7 = vpop.f32.mrf.mxu2 }
 0x17a   : > { %v1983_v9 = vadd.f32 %v1965_v1, %v738_v7  ;;  %v926_v7 = vmul.f32 %v888_v57, %v1980_v8 }
 0x17c   : > { %v1404_v10 = vpack.c.bf16 %v1983_v9, %v1980_v8  ;;  %v889_v62 = vmul.f32 %v1335_v55, %v1983_v9 }
 0x17e   : > { %1436 = vst [vmem:[%s1976_s16 + $0x8] sm:$0xff] %v1404_v10  }
 0x181   : > { %v741_v11 = vpop.f32.mrf.mxu2 }
 0x182   : > { %v1989_v14 = vadd.f32 %v1965_v1, %v741_v11  ;;  %v1338_v11 = vsel %vm844_vm6, 1.0, %v1780_v44 }
 0x184   : > { %v890_v10 = vmul.f32 %v1336_v58, %v1989_v14 }
 0x186   : > { %v761_v12 = vpop.f32.mrf.mxu3  ;;  %v928_v27 = vmul.f32 %v890_v10, %v1989_v14 }
 0x187   : > { %v1998_v19 = vadd.f32 %v1965_v1, %v761_v12 }
 0x189   : > { %v743_v13 = vpop.f32.mrf.mxu2 }
 0x18a   : > { %v1992_v15 = vadd.f32 %v1965_v1, %v743_v13  ;;  %v831_v13 = vadd.s32 %v2010_v26, %v814_v60 }
 0x18c   : > { %v1409_v16 = vpack.c.bf16 %v1992_v15, %v1989_v14  ;;  %v891_v8 = vmul.f32 %v1337_v0, %v1992_v15  ;;  %vm847_vm9 = vcmp.lt.s32.totalorder %v831_v13, 160  ;;  %v818_v14 = vadd.s32 104, %v2005_v23 }
 0x18d   : > { %v1341_v45 = vsel %vm847_vm9, 1.0, %v1780_v44 }
 0x18e   : > { %1437 = vst [vmem:[%s1976_s16 + $0x10] sm:$0xff] %v1409_v16   ;;  %v763_v17 = vpop.f32.mrf.mxu3  ;;  %v940_v16 = vadd.f32 %v925_v61, %v924_v63  ;;  %v929_v35 = vmul.f32 %v891_v8, %v1992_v15  ;;  %v837_v61 = vadd.s32 %v2010_v26, %v820_v51 }
 0x18f   : > { %v2001_v20 = vadd.f32 %v1965_v1, %v763_v17  ;;  %v927_v17 = vmul.f32 %v889_v62, %v1983_v9  ;;  %v816_v9 = vadd.s32 88, %v2005_v23  ;;  %v1344_v23 = vsel %vm850_vm11, 1.0, %v1780_v44 }
 0x190   : > { %vm853_vm15 = vcmp.lt.s32.totalorder %v837_v61, 160 }
 0x191   : > { %v1429_v21 = vpack.c.bf16 %v2001_v20, %v1998_v19  ;;  %v746_v22 = vpop.f32.mrf.mxu2 }
 0x192   : > { %v2018_v32 = vadd.f32 %v1965_v1, %v746_v22 }
 0x193   : > { %1441 = vst [vmem:[%s1976_s16 + $0x30] sm:$0xff] %v1429_v21   ;;  %v903_v21 = vadd.f32 %v902_v6, %v888_v57  ;;  %v836_v57 = vadd.s32 %v2010_v26, %v819_v41 }
 0x194   : > { %v892_v28 = vmul.f32 %v1338_v11, %v2018_v32  ;;  %v898_v11 = vmul.f32 %v1344_v23, %v1998_v19 }
 0x195   : > { %vm852_vm14 = vcmp.lt.s32.totalorder %v836_v57, 160 }
 0x196   : > { %v766_v25 = vpop.f32.mrf.mxu3 }
 0x197   : > { %v2033_v42 = vadd.f32 %v1965_v1, %v766_v25  ;;  %v941_v25 = vadd.f32 %v940_v16, %v926_v7  ;;  %v1346_v16 = vsel %vm852_vm14, 1.0, %v1780_v44 }
 0x199   : > { %v748_v30 = vpop.f32.mrf.mxu2  ;;  %v942_v31 = vadd.f32 %v941_v25, %v927_v17 }
 0x19a   : > { %v2021_v33 = vadd.f32 %v1965_v1, %v748_v30  ;;  %v904_v30 = vadd.f32 %v903_v21, %v889_v62  ;;  %v1347_v21 = vsel %vm853_vm15, 1.0, %v1780_v44 }
 0x19b   : > { %v943_v39 = vadd.f32 %v942_v31, %v928_v27 }
 0x19c   : > { %v1414_v36 = vpack.c.bf16 %v2021_v33, %v2018_v32  ;;  %v905_v37 = vadd.f32 %v904_v30, %v890_v10  ;;  %v893_v38 = vmul.f32 %v1339_v29, %v2021_v33 }
 0x19d   : > { %v944_v50 = vadd.f32 %v943_v39, %v929_v35 }
 0x19e   : > { %1438 = vst [vmem:[%s1976_s16 + $0x18] sm:$0xff] %v1414_v36   ;;  %v768_v40 = vpop.f32.mrf.mxu3  ;;  %v1340_v36 = vsel %vm846_vm8, 1.0, %v1780_v44  ;;  %v906_v47 = vadd.f32 %v905_v37, %v891_v8  ;;  %v931_v54 = vmul.f32 %v893_v38, %v2021_v33 }
 0x19f   : > { %v2036_v43 = vadd.f32 %v1965_v1, %v768_v40  ;;  %v930_v40 = vmul.f32 %v892_v28, %v2018_v32  ;;  %v835_v32 = vadd.s32 %v2010_v26, %v818_v14 }
 0x1a0   : > { %v907_v53 = vadd.f32 %v906_v47, %v892_v28 }
 0x1a1   : > { %v1434_v48 = vpack.c.bf16 %v2036_v43, %v2033_v42  ;;  %v751_v49 = vpop.f32.mrf.mxu2  ;;  %v945_v56 = vadd.f32 %v944_v50, %v930_v40  ;;  %vm851_vm13 = vcmp.lt.s32.totalorder %v835_v32, 160 }
 0x1a2   : > { %v752_v4 = vadd.f32 %v1965_v1, %v751_v49  ;;  %v833_v49 = vadd.s32 %v2010_v26, %v816_v9  ;;  %v908_v58 = vadd.f32 %v907_v53, %v893_v38  ;;  %v1345_v26 = vsel %vm851_vm13, 1.0, %v1780_v44 }
 0x1a3   : > { %1442 = vst [vmem:[%s1976_s16 + $0x38] sm:$0xff] %v1434_v48   ;;  %v946_v62 = vadd.f32 %v945_v56, %v931_v54 }
 0x1a4   : > { %v894_v48 = vmul.f32 %v1340_v36, %v752_v4  ;;  %vm849_vm12 = vcmp.lt.s32.totalorder %v833_v49, 160 }
 0x1a5   : > { %v1343_v2 = vsel %vm849_vm12, 1.0, %v1780_v44 }
 0x1a6   : > { %v932_v59 = vmul.f32 %v894_v48, %v752_v4  ;;  %v909_v63 = vadd.f32 %v908_v58, %v894_v48 }
 0x1a8   : > { %v947_v5 = vadd.f32 %v946_v62, %v932_v59 }
 0x1a9   : > { %v753_v12 = vpop.f32.mrf.mxu2 }
 0x1aa   : > { %v754_v3 = vadd.f32 %v1965_v1, %v753_v12 }
 0x1ac   : > { %v1419_v22 = vpack.c.bf16 %v754_v3, %v752_v4  ;;  %v895_v55 = vmul.f32 %v1341_v45, %v754_v3 }
 0x1ae   : > { %1439 = vst [vmem:[%s1976_s16 + $0x20] sm:$0xff] %v1419_v22   ;;  %v933_v33 = vmul.f32 %v895_v55, %v754_v3  ;;  %v910_v6 = vadd.f32 %v909_v63, %v895_v55 }
 0x1b0   : > { %v948_v12 = vadd.f32 %v947_v5, %v933_v33 }
 0x1b1   : > { %v756_v46 = vpop.f32.mrf.mxu2 }
 0x1b2   : > { %v757_v15 = vadd.f32 %v1965_v1, %v756_v46 }
 0x1b4   : > { %v896_v60 = vmul.f32 %v1342_v52, %v757_v15 }
 0x1b6   : > { %v934_v7 = vmul.f32 %v896_v60, %v757_v15  ;;  %v911_v4 = vadd.f32 %v910_v6, %v896_v60 }
 0x1b8   : > { %v949_v17 = vadd.f32 %v948_v12, %v934_v7 }
 0x1b9   : > { %v758_v0 = vpop.f32.mrf.mxu2 }
 0x1ba   : > { %v759_v10 = vadd.f32 %v1965_v1, %v758_v0  ;;  %v899_v1 = vmul.f32 %v1345_v26, %v2001_v20 }
 0x1bc   : > { %v1424_v3 = vpack.c.bf16 %v759_v10, %v757_v15  ;;  %v897_v13 = vmul.f32 %v1343_v2, %v759_v10 }
 0x1be   : > { %1440 = vst [vmem:[%s1976_s16 + $0x28] sm:$0xff] %v1424_v3   ;;  %v912_v18 = vadd.f32 %v911_v4, %v897_v13  ;;  %v935_v8 = vmul.f32 %v897_v13, %v759_v10 }
 0x1bf   : > { %1669 = shalt.err (!%p1666_p10)
}
 0x1c0   : > { %s1781_s16 = smov 64   ;;  %s1782_s11 = smov 4   ;;  %v936_v44 = vmul.f32 %v898_v11, %v1998_v19  ;;  %v900_v22 = vmul.f32 %v1346_v16, %v2033_v42  ;;  %v913_v24 = vadd.f32 %v912_v18, %v898_v11  ;;  %v950_v25 = vadd.f32 %v949_v17, %v935_v8 }
 0x1c1   : > { %1477 = dma.vmem_to_hbm [thread:$0]  (%p1886_p3), %s2102_s7, 1024, %s2104_s14, %s963_s9, %s1781_s16, %s1781_s16, %s1782_s11   ;;  %v937_v27 = vmul.f32 %v899_v1, %v2001_v20  ;;  %v901_v28 = vmul.f32 %v1347_v21, %v2036_v43 }
 0x1c2   : > { %v914_v29 = vadd.f32 %v913_v24, %v899_v1  ;;  %v951_v30 = vadd.f32 %v950_v25, %v936_v44  ;;  %v938_v9 = vmul.f32 %v900_v22, %v2033_v42  ;;  %s997_s7 = scalar_lea.hbm %s2205_s5, %s1839_s25  ;;  %s967_s14 = sand.u32 1, %s1839_s25  }
 0x1c3   : > { %v939_v19 = vmul.f32 %v901_v28, %v2036_v43  ;;  %s1010_s26 = scalar_lea.hbm %s2206_s6, %s1839_s25  ;;  %s315_s27 = scalar_lea.vmem [#allocation9], %s1916_s10 }
 0x1c4   : > { %v915_v31 = vadd.f32 %v914_v29, %v900_v22  ;;  %v952_v34 = vadd.f32 %v951_v30, %v937_v27  ;;  %s2141_s8 = sshll.u32 %s315_s27, 4  ;;  %s2143_s15 = sshll.u32 %s997_s7, 4  ;;  %s1000_s8 = int_to_ptr.vmem [resolvable:$true] %s2141_s8  ;;  %s1002_s15 = int_to_ptr.hbm [resolvable:$true] %s2143_s15 }
 0x1c5   : > { %s321_s17 = scalar_lea.vmem [#allocation11], %s1916_s10  ;;  %s2148_s16 = sshll.u32 %s1010_s26, 4  ;;  %s1015_s16 = int_to_ptr.hbm [resolvable:$true] %s2148_s16 }
 0x1c6   : > { %v916_v35 = vadd.f32 %v915_v31, %v901_v28  ;;  %v953_v36 = vadd.f32 %v952_v34, %v938_v9  ;;  %s2146_s19 = sshll.u32 %s321_s17, 4  ;;  %s968_s25 = scalar_lea.sflag [#allocation10], %s967_s14  ;;  %s1013_s19 = int_to_ptr.vmem [resolvable:$true] %s2146_s19 }
 0x1c7   : > { %s1684_s11 = sshra.s32 %s1002_s15, 4  ;;  %s1690_s7 = scalar_lea.hbm %s2205_s5, 2  ;;  %s1685_s11 = int_to_ptr.hbm [resolvable:$true] %s1684_s11 }
 0x1c8   : > { %v954_v37 = vadd.f32 %v953_v36, %v939_v19  ;;  %v917_v14 = vrot.slane %v916_v35, 4  ;;  %s1686_s12 = scalar_lea.hbm %s1685_s11, 1  ;;  %p1691_p5 = scmp.lt.s32.totalorder %s1685_s11, %s2205_s5 }
 0x1c9   : > { %p1687_p12 = scmp.ne.s32.totalorder %s1685_s11, %s1686_s12  ;;  %p1692_p7 = scmp.lt.s32.totalorder %s1690_s7, %s1686_s12 }
 0x1ca   : > { %v955_v38 = vrot.slane %v954_v37, 4  ;;  %v918_v20 = vadd.f32 %v917_v14, %v916_v35 }
 0x1cb   : > { %p1688_p13 = pnand %p1687_p12, %p1886_p3  ;;  %p1693_p1 = por %p1692_p7, %p1691_p5 }
 0x1cc   : > { %v919_v39 = vrot.slane %v918_v20, 2  ;;  %v956_v40 = vadd.f32 %v955_v38, %v954_v37 }
 0x1cd   : > { %p1689_p0 = pneg %p1688_p13 }
 0x1ce   : > { %v920_v42 = vadd.f32 %v919_v39, %v918_v20  ;;  %v957_v41 = vrot.slane %v956_v40, 2 }
 0x1cf   : > { %p1694_p4 = pnand %p1693_p1, %p1689_p0 }
 0x1d0   : > { %v921_v43 = vrot.slane %v920_v42, 1  ;;  %v958_v45 = vadd.f32 %v957_v41, %v956_v40 }
 0x1d2   : > { %v922_v46 = vadd.f32 %v921_v43, %v920_v42  ;;  %v959_v47 = vrot.slane %v958_v45, 1 }
 0x1d4   : > { %923 = vst [vmem:[%s315_s27] sm:$0x1] %v922_v46  ;;  %v960_v48 = vadd.f32 %v959_v47, %v958_v45 }
 0x1d5   : > { %1697 = shalt.err (!%p1694_p4)
}
 0x1d6   : > { %1478 = dma.vmem_to_hbm [thread:$0]  (%p1886_p3), %s1000_s8, 16, %s1002_s15, %s968_s25   ;;  %961 = vst [vmem:[%s321_s17] sm:$0x1] %v960_v48 }
 0x1d7   : > { %s1712_s14 = sshra.s32 %s1015_s16, 4  ;;  %s1718_s12 = scalar_lea.hbm %s2206_s6, 2  ;;  %s1713_s14 = int_to_ptr.hbm [resolvable:$true] %s1712_s14 }
 0x1d8   : > { %s1714_s26 = scalar_lea.hbm %s1713_s14, 1  ;;  %p1719_p9 = scmp.lt.s32.totalorder %s1713_s14, %s2206_s6 }
 0x1d9   : > { %p1715_p8 = scmp.ne.s32.totalorder %s1713_s14, %s1714_s26  ;;  %p1720_p10 = scmp.lt.s32.totalorder %s1718_s12, %s1714_s26 }
 0x1db   : > { %p1716_p11 = pnand %p1715_p8, %p1886_p3  ;;  %p1721_p12 = por %p1720_p10, %p1719_p9 }
 0x1dd   : > { %p1717_p2 = pneg %p1716_p11 }
 0x1df   : > { %p1722_p13 = pnand %p1721_p12, %p1717_p2 }
 0x1e1   : > { %1725 = shalt.err (!%p1722_p13)
}
 0x1e2   : > { %1479 = dma.vmem_to_hbm [thread:$0]  (%p1886_p3), %s1013_s19, 16, %s1015_s16, %s968_s25  }
 0x1e3 PF: > { %s1026_s8 = sand.u32 1, %s1760_s21   ;;  %p2213_p0 = scmp.ge.s32.totalorder %s1772_s24, 2 }
 0x1e4   : > { %s1027_s15 = scalar_lea.sflag [#allocation4], %s1026_s8 }
 0x1e5   : > { %p1495_p5 = pnand %p2213_p0, %p1855_p6 }
 0x1e7   : > { %p1496_p7 = pneg %p1495_p5 }
 0x1e9   : > { %1751 = dma.done.wait (%p1496_p7), %s1027_s15, 1024  }
 0x1ea   : > { %1753 = vsyncadd (%p1496_p7), %s1027_s15, 4294966272  ;;  %s2214_s17 = sadd.s32 4294967294, %s1772_s24  }
 0x1eb   : > { %s1036_s29 = sand.u32 1, %s2214_s17  }
 0x1ec   : > { %s1037_s7 = scalar_lea.sflag [#allocation10], %s1036_s29 }
 0x1ed   : > { %1755 = dma.done.wait (%p1496_p7), %s1037_s7, 32  }
 0x1ee   : > { %1757 = vsyncadd (%p1496_p7), %s1037_s7, 4294967264  ;;  %p24_p3 = scmp.ge.s32.totalorder %s1876_s18, 4   ;;  %s2215_s21 = smov %s1764_s22 }
 0x1ef   : > { %s2216_s22 = smov %s1768_s23  ;;  %s2217_s23 = smov %s1892_s30 }
 0x1f0   : > { %s2218_s24 = smov %s1876_s18  ;;  %26 = sbr.rel (!%p24_p3) target bundleno = 8 (0x8), region = 121 }
 0x1f5   :  { %1051 = vsyncpa [#allocation3], 1 }
 0x1f6   :  { %1053 = vsyncpa [#allocation3 + $0x1], 1 }
 0x1f7   :  { %1054 = vsyncpa [#allocation6], 1 }
 0x1f8   :  { %1055 = vsyncpa [#allocation4], 1 }
 0x1f9   :  { %1057 = vsyncpa [#allocation4 + $0x1], 1 }
 0x1fa   :  { %1058 = vsyncpa [#allocation10], 1 }
 0x1fb   :  { %1060 = vsyncpa [#allocation10 + $0x1], 1 }

</bundles_post_ra>
